<compile_context>
chip_gen: v7x
topology: tpu7x:2x2x1
jax: 0.10.0
libtpu: 0.0.40
codegen_flags: <defaults>
</compile_context>

<pallas_src>
import functools
import math

import jax
import jax.numpy as jnp
from jax.experimental import pallas as pl
from jax.experimental.pallas import tpu as pltpu

_MIB = 1024 * 1024


def _round_up(x, m):
    return ((x + m - 1) // m) * m


def _cdiv(a, b):
    return (a + b - 1) // b


def _pick_row_tiling(m, tm):
    """(tm_eff, m_pad): minimize zero-row padding; prefer an even tile count
    (v7x shards the parallel row axis across its 2 TensorCores)."""
    nt = max(1, _cdiv(m, max(tm, 8)))
    cands = {nt}
    if m > 8 and nt % 2 == 1:
        cands.add(nt + 1)
    best = None
    for n in sorted(cands):
        t = _round_up(_cdiv(m, n), 8)
        pad = t * n - m
        key = (pad, n % 2, n)  # least padding first, then prefer even count
        if best is None or key < best[0]:
            best = (key, t, t * n)
    return best[1], best[2]


def _vmem_budget_bytes(fraction=0.8):
    try:
        cap = int(pltpu.get_tpu_info().vmem_capacity_bytes)
    except Exception:
        cap = 64 * _MIB  # conservative fallback: v7x has 64 MiB per TensorCore
    return int(cap * fraction)


# ---------------------------------------------------------------------------
# Kernel
# ---------------------------------------------------------------------------
def _mlp_kernel(x_ref, w1_ref, b1_ref, w2_ref, b2_ref, o_ref, acc_ref,
                *h_cache, mm_dtype, gelu_approx):
    """Fused fc1 -> GELU -> (dropout = identity) -> fc2 for one block.

    Grid = (i, j, k):
      i: token-row tiles (parallel)
      j: output-column tiles (parallel when n_j==1, else arbitrary w/ cache)
      k: hidden-dim tiles (arbitrary, innermost; fc2 reduction axis)
    acc_ref (f32) stays resident across k.  Optional h_cache scratch of shape
    (n_k, tm, tk) holds fc1+GELU results so they are computed once per row
    tile instead of once per output-column tile.
    """
    j = pl.program_id(1)
    k = pl.program_id(2)
    use_cache = len(h_cache) > 0

    @pl.when(k == 0)
    def _():
        acc_ref[...] = jnp.zeros_like(acc_ref)

    def _fc1_gelu():
        # fc1 chunk: (tm, Din) @ (Din, tk) + b1[k-chunk]; f32 MXU accumulation.
        h = jnp.dot(x_ref[...], w1_ref[...], preferred_element_type=jnp.float32)
        h = h + b1_ref[...]
        if gelu_approx:
            h = jax.nn.gelu(h, approximate=True)  # cheaper tanh form on the VPU
        else:
            # Exact erf GELU, matching torch.nn.GELU() default numerics.
            h = 0.5 * h * (1.0 + jax.lax.erf(h * (1.0 / math.sqrt(2.0))))
        # TODO(synk): dropout omitted (inference identity); training-mode
        # dropout would mask here via pltpu.prng_seed + pltpu.prng_random_bits.
        return h.astype(mm_dtype)

    if use_cache:
        hc_ref = h_cache[0]

        @pl.when(j == 0)
        def _():
            hc_ref[k] = _fc1_gelu()

        h = hc_ref[k]
        # Note: W1/b1 tiles are still streamed for j > 0 (unused); acceptable
        # since the cache path is only taken when d_out is split.
    else:
        h = _fc1_gelu()

    # fc2 partial product accumulated over the hidden-dim tiles.
    acc_ref[...] += jnp.dot(h, w2_ref[...], preferred_element_type=jnp.float32)

    @pl.when(k == pl.num_programs(2) - 1)
    def _():
        o_ref[...] = (acc_ref[...] + b2_ref[...]).astype(o_ref.dtype)


# ---------------------------------------------------------------------------
# Host-side wrappers
# ---------------------------------------------------------------------------
def prepare_mlp_weights(w1, b1, w2, b2, *, tk=512, tn=None,
                        matmul_dtype=jnp.bfloat16):
    """Pad to lane-dense multiples of 128 and cast MXU operands ONCE.

    Hoisting this out of the per-call path removes a weight-sized HBM round
    trip (separate pad/astype XLA ops) on every forward call.
    """
    d_in, hid = w1.shape
    hid2, d_out = w2.shape
    assert hid == hid2 and b1.shape == (hid,) and b2.shape == (d_out,)

    d_in_pad = _round_up(d_in, 128)
    tk_eff = min(_round_up(tk, 128), _round_up(hid, 128))
    h_pad = _round_up(hid, tk_eff)
    d_out_128 = _round_up(d_out, 128)
    tn_eff = d_out_128 if tn is None else min(_round_up(tn, 128), d_out_128)
    d_out_pad = _round_up(d_out, tn_eff)

    w1p = jnp.pad(w1, ((0, d_in_pad - d_in), (0, h_pad - hid))).astype(matmul_dtype)
    b1p = jnp.pad(b1, (0, h_pad - hid)).reshape(1, h_pad).astype(jnp.float32)
    w2p = jnp.pad(w2, ((0, h_pad - hid), (0, d_out_pad - d_out))).astype(matmul_dtype)
    b2p = jnp.pad(b2, (0, d_out_pad - d_out)).reshape(1, d_out_pad).astype(jnp.float32)

    meta = dict(d_in=d_in, hid=hid, d_out=d_out,
                d_in_pad=d_in_pad, h_pad=h_pad, d_out_pad=d_out_pad,
                tk_eff=tk_eff, tn_eff=tn_eff,
                matmul_dtype=jnp.dtype(matmul_dtype))
    return dict(w1=w1p, b1=b1p, w2=w2p, b2=b2p, meta=meta)


def mlp_forward_prepared(x, prepared, *, tm=256, gelu_approx=False,
                         weight_buffers=2):
    """y = GELU(x @ W1 + b1) @ W2 + b2 with pre-padded / pre-cast weights."""
    w1p, b1p = prepared["w1"], prepared["b1"]
    w2p, b2p = prepared["w2"], prepared["b2"]
    meta = prepared["meta"]
    d_in, d_out = meta["d_in"], meta["d_out"]
    d_in_pad, h_pad, d_out_pad = meta["d_in_pad"], meta["h_pad"], meta["d_out_pad"]
    tk_eff, tn_eff = meta["tk_eff"], meta["tn_eff"]
    mm_dtype = meta["matmul_dtype"]

    orig_dtype = x.dtype
    lead = x.shape[:-1]
    assert x.shape[-1] == d_in
    x2 = x.reshape(-1, d_in)
    m = x2.shape[0]

    n_k = h_pad // tk_eff
    n_j = d_out_pad // tn_eff
    use_h_cache = n_j > 1

    mm_bytes = mm_dtype.itemsize
    out_bytes = jnp.dtype(orig_dtype).itemsize
    budget = _vmem_budget_bytes()

    def vmem_need(tm_e):
        need = (2 * tm_e * d_in_pad * mm_bytes        # x tile (double-buffered)
                + 2 * d_in_pad * tk_eff * mm_bytes    # W1 tile
                + 2 * tk_eff * 4                      # b1 chunk
                + 2 * tk_eff * tn_eff * mm_bytes      # W2 tile
                + 2 * tn_eff * 4                      # b2 chunk
                + 2 * tm_e * tn_eff * out_bytes       # output tile
                + tm_e * tn_eff * 4)                  # f32 accumulator scratch
        if use_h_cache:
            need += n_k * tm_e * tk_eff * mm_bytes    # resident fc1/GELU cache
        return need

    # Row tiling: minimize padding, prefer even tile count, fit the VMEM budget.
    tm_req = tm
    tm_eff, m_pad = _pick_row_tiling(m, tm_req)
    while vmem_need(tm_eff) > budget and tm_eff > 8:
        tm_req = max(8, tm_req // 2)
        tm_eff, m_pad = _pick_row_tiling(m, tm_req)

    grid = (m_pad // tm_eff, n_j, n_k)

    # Activations: cast to the MXU operand dtype on the host (halves x DMA
    # bytes for bf16 and removes the per-grid-step in-kernel cast).
    if m_pad == m and d_in_pad == d_in:
        xp = x2.astype(mm_dtype)
    else:
        xp = jnp.pad(x2, ((0, m_pad - m), (0, d_in_pad - d_in))).astype(mm_dtype)

    vmem_limit = min(max(32 * _MIB, int(1.25 * vmem_need(tm_eff))), budget)

    n_fc1 = 1 if use_h_cache else n_j
    cost = pl.CostEstimate(
        flops=2 * m_pad * d_in_pad * h_pad * n_fc1 + 2 * m_pad * h_pad * d_out_pad,
        transcendentals=m_pad * h_pad * n_fc1,
        bytes_accessed=(xp.size * mm_bytes
                        + w1p.size * mm_bytes * n_fc1
                        + w2p.size * mm_bytes
                        + m_pad * d_out_pad * out_bytes),
    )

    def w_spec(shape, idx):
        # Deeper weight pipelining (e.g. 3 on v5e) hides exposed weight DMA.
        if weight_buffers != 2:
            return pl.BlockSpec(shape, idx, pipeline_mode=pl.Buffered(weight_buffers))
        return pl.BlockSpec(shape, idx)

    scratch_shapes = [pltpu.VMEM((tm_eff, tn_eff), jnp.float32)]
    if use_h_cache:
        scratch_shapes.append(pltpu.VMEM((n_k, tm_eff, tk_eff), mm_dtype))

    dim_sem = ("parallel",
               "arbitrary" if use_h_cache else "parallel",
               "arbitrary")

    kernel = functools.partial(_mlp_kernel, mm_dtype=mm_dtype,
                               gelu_approx=gelu_approx)

    out = pl.pallas_call(
        kernel,
        out_shape=jax.ShapeDtypeStruct((m_pad, d_out_pad), orig_dtype),
        grid_spec=pltpu.PrefetchScalarGridSpec(
            num_scalar_prefetch=0,
            grid=grid,
            in_specs=[
                pl.BlockSpec((tm_eff, d_in_pad), lambda i, j, k: (i, 0)),  # x rows
                w_spec((d_in_pad, tk_eff), lambda i, j, k: (0, k)),        # W1 cols
                pl.BlockSpec((1, tk_eff), lambda i, j, k: (0, k)),         # b1 chunk
                w_spec((tk_eff, tn_eff), lambda i, j, k: (k, j)),          # W2 tile
                pl.BlockSpec((1, tn_eff), lambda i, j, k: (0, j)),         # b2 chunk
            ],
            out_specs=pl.BlockSpec((tm_eff, tn_eff), lambda i, j, k: (i, j)),
            scratch_shapes=scratch_shapes,
        ),
        compiler_params=pltpu.CompilerParams(
            dimension_semantics=dim_sem,
            vmem_limit_bytes=vmem_limit,
        ),
        cost_estimate=cost,
    )(xp, w1p, b1p, w2p, b2p)

    if m_pad != m or d_out_pad != d_out:
        out = out[:m, :d_out]
    return out.reshape(*lead, d_out)


def mlp_forward(x, w1, b1, w2, b2, *, tm=256, tk=512, tn=None,
                matmul_dtype=jnp.bfloat16, gelu_approx=False, weight_buffers=2):
    """One-shot convenience wrapper (pads/casts weights per call).  For
    repeated inference calls, use prepare_mlp_weights + mlp_forward_prepared."""
    prepared = prepare_mlp_weights(w1, b1, w2, b2, tk=tk, tn=tn,
                                   matmul_dtype=matmul_dtype)
    return mlp_forward_prepared(x, prepared, tm=tm, gelu_approx=gelu_approx,
                                weight_buffers=weight_buffers)


def init_mlp_params(key, input_dim, hidden_dim, output_dim):
    """nn.Linear-style uniform init; weights stored (in, out)."""
    k1, k2, k3, k4 = jax.random.split(key, 4)
    lim1 = 1.0 / math.sqrt(input_dim)
    lim2 = 1.0 / math.sqrt(hidden_dim)
    w1 = jax.random.uniform(k1, (input_dim, hidden_dim), jnp.float32, -lim1, lim1)
    b1 = jax.random.uniform(k2, (hidden_dim,), jnp.float32, -lim1, lim1)
    w2 = jax.random.uniform(k3, (hidden_dim, output_dim), jnp.float32, -lim2, lim2)
    b2 = jax.random.uniform(k4, (output_dim,), jnp.float32, -lim2, lim2)
    return w1, b1, w2, b2


if __name__ == "__main__":
    key = jax.random.PRNGKey(0)
    kx, kp, kx2, kp2 = jax.random.split(key, 4)

    def ref_mlp(x, w1, b1, w2, b2):
        h = x @ w1 + b1
        h = 0.5 * h * (1.0 + jax.lax.erf(h / math.sqrt(2.0)))
        return h @ w2 + b2  # dropout = identity (inference)

    # ---- config 1: tiny projector, single output tile ----------------------
    batch, seq = 2, 8
    d_in, hid, d_out = 32, 64, 32
    x = jax.random.normal(kx, (batch, seq, d_in), jnp.float32)
    w1, b1, w2, b2 = init_mlp_params(kp, d_in, hid, d_out)
    y_ref = ref_mlp(x, w1, b1, w2, b2)

    # default path: bf16 MXU operands, f32 accumulation, weights prepared once.
    prepared = prepare_mlp_weights(w1, b1, w2, b2)
    y = mlp_forward_prepared(x, prepared)
    jax.block_until_ready(y)
    assert y.shape == (batch, seq, d_out)
    assert jnp.allclose(y, y_ref, atol=5e-2, rtol=5e-2)

    # reuse prepared weights across calls (no per-call pad/cast)
    y_again = mlp_forward_prepared(x, prepared)
    jax.block_until_ready(y_again)
    assert jnp.array_equal(y_again, y)

    # f32-operand path matches the reference tightly.
    y_f32 = mlp_forward(x, w1, b1, w2, b2, matmul_dtype=jnp.float32)
    jax.block_until_ready(y_f32)
    assert jnp.allclose(y_f32, y_ref, atol=1e-5, rtol=1e-5)

    # ---- config 2: split output tiles -> exercises the fc1/GELU h-cache ----
    d_in2, hid2, d_out2 = 64, 256, 256
    x2 = jax.random.normal(kx2, (batch, seq, d_in2), jnp.float32)
    w1b, b1b, w2b, b2b = init_mlp_params(kp2, d_in2, hid2, d_out2)
    y2_ref = ref_mlp(x2, w1b, b1b, w2b, b2b)
    y2 = mlp_forward(x2, w1b, b1b, w2b, b2b, tk=128, tn=128,
                     matmul_dtype=jnp.float32)
    jax.block_until_ready(y2)
    assert y2.shape == (batch, seq, d_out2)
    assert jnp.allclose(y2, y2_ref, atol=1e-4, rtol=1e-4)

    print("KERNEL_OK")
</pallas_src>

<mosaic_0001>
module attributes {stable_mosaic.version = 11 : i64} {
  func.func @_mlp_kernel(%arg0: i32, %arg1: i32, %arg2: i32, %arg3: memref<8x128xbf16, #tpu.memory_space<vmem>>, %arg4: memref<128x128xbf16, #tpu.memory_space<vmem>>, %arg5: memref<1x128xf32, #tpu.memory_space<vmem>>, %arg6: memref<128x128xbf16, #tpu.memory_space<vmem>>, %arg7: memref<1x128xf32, #tpu.memory_space<vmem>>, %arg8: memref<8x128xf32, #tpu.memory_space<vmem>>, %arg9: memref<8x128xf32, #tpu.memory_space<vmem>>) attributes {dimension_semantics = [#tpu.dimension_semantics<parallel>, #tpu.dimension_semantics<parallel>, #tpu.dimension_semantics<arbitrary>], iteration_bounds = array<i64: 2, 1, 1>, scalar_prefetch = 0 : i64, scratch_operands = 1 : i64, tpu.core_type = #tpu.core_type<tc>, window_params = [{transform_indices = @transform_0, window_bounds = array<i64: 8, 128>}, {transform_indices = @transform_1, window_bounds = array<i64: 128, 128>}, {transform_indices = @transform_2, window_bounds = array<i64: 1, 128>}, {transform_indices = @transform_3, window_bounds = array<i64: 128, 128>}, {transform_indices = @transform_4, window_bounds = array<i64: 1, 128>}, {transform_indices = @transform_5, window_bounds = array<i64: 8, 128>}]} {
    %c0_i32 = arith.constant 0 : i32
    %0 = arith.cmpi eq, %arg2, %c0_i32 : i32
    %1 = arith.extui %0 : i1 to i32
    %c0_i32_0 = arith.constant 0 : i32
    %2 = arith.cmpi ne, %1, %c0_i32_0 : i32
    scf.if %2 {
      %cst_18 = arith.constant 0.000000e+00 : f32
      %26 = vector.broadcast %cst_18 : f32 to vector<8x128xf32>
      %c0_19 = arith.constant 0 : index
      %c0_20 = arith.constant 0 : index
      %27 = vector.load %arg9[%c0_19, %c0_20] : memref<8x128xf32, #tpu.memory_space<vmem>>, vector<8x128xf32>
      tpu.vector_store %arg9[%c0_19, %c0_20], %26 {strides = array<i32>} : memref<8x128xf32, #tpu.memory_space<vmem>>, vector<8x128xf32>,
    } else {
    }
    %c0 = arith.constant 0 : index
    %c0_1 = arith.constant 0 : index
    %3 = vector.load %arg3[%c0, %c0_1] : memref<8x128xbf16, #tpu.memory_space<vmem>>, vector<8x128xbf16>
    %c0_2 = arith.constant 0 : index
    %c0_3 = arith.constant 0 : index
    %4 = vector.load %arg4[%c0_2, %c0_3] : memref<128x128xbf16, #tpu.memory_space<vmem>>, vector<128x128xbf16>
    %cst = arith.constant dense<0.000000e+00> : vector<8x128xf32>
    %5 = tpu.matmul %3, %4, %cst {dimension_numbers = #tpu.dot_dimension_numbers<[1], [0], [0], [1], [0, 0, 1, 1], [], []>} : vector<8x128xbf16>, vector<128x128xbf16>, vector<8x128xf32> -> vector<8x128xf32>
    %c0_4 = arith.constant 0 : index
    %c0_5 = arith.constant 0 : index
    %6 = vector.load %arg5[%c0_4, %c0_5] : memref<1x128xf32, #tpu.memory_space<vmem>>, vector<1x128xf32>
    %7 = vector.broadcast %6 : vector<1x128xf32> to vector<8x128xf32>
    %8 = arith.addf %5, %7 : vector<8x128xf32>
    %cst_6 = arith.constant 5.000000e-01 : f32
    %9 = vector.broadcast %cst_6 : f32 to vector<8x128xf32>
    %10 = arith.mulf %9, %8 : vector<8x128xf32>
    %cst_7 = arith.constant 0.707106769 : f32
    %11 = vector.broadcast %cst_7 : f32 to vector<8x128xf32>
    %12 = arith.mulf %8, %11 : vector<8x128xf32>
    %13 = math.erf %12 : vector<8x128xf32>
    %cst_8 = arith.constant 1.000000e+00 : f32
    %14 = vector.broadcast %cst_8 : f32 to vector<8x128xf32>
    %15 = arith.addf %14, %13 : vector<8x128xf32>
    %16 = arith.mulf %10, %15 : vector<8x128xf32>
    %17 = arith.truncf %16 : vector<8x128xf32> to vector<8x128xbf16>
    %c0_9 = arith.constant 0 : index
    %c0_10 = arith.constant 0 : index
    %18 = vector.load %arg9[%c0_9, %c0_10] : memref<8x128xf32, #tpu.memory_space<vmem>>, vector<8x128xf32>
    %c0_11 = arith.constant 0 : index
    %c0_12 = arith.constant 0 : index
    %19 = vector.load %arg6[%c0_11, %c0_12] : memref<128x128xbf16, #tpu.memory_space<vmem>>, vector<128x128xbf16>
    %cst_13 = arith.constant dense<0.000000e+00> : vector<8x128xf32>
    %20 = tpu.matmul %17, %19, %cst_13 {dimension_numbers = #tpu.dot_dimension_numbers<[1], [0], [0], [1], [0, 0, 1, 1], [], []>} : vector<8x128xbf16>, vector<128x128xbf16>, vector<8x128xf32> -> vector<8x128xf32>
    %21 = arith.addf %18, %20 : vector<8x128xf32>
    %c0_14 = arith.constant 0 : index
    %c0_15 = arith.constant 0 : index
    %22 = vector.load %arg9[%c0_14, %c0_15] : memref<8x128xf32, #tpu.memory_space<vmem>>, vector<8x128xf32>
    tpu.vector_store %arg9[%c0_14, %c0_15], %21 {strides = array<i32>} : memref<8x128xf32, #tpu.memory_space<vmem>>, vector<8x128xf32>,
    %c0_i32_16 = arith.constant 0 : i32
    %23 = arith.cmpi eq, %arg2, %c0_i32_16 : i32
    %24 = arith.extui %23 : i1 to i32
    %c0_i32_17 = arith.constant 0 : i32
    %25 = arith.cmpi ne, %24, %c0_i32_17 : i32
    scf.if %25 {
      %c0_18 = arith.constant 0 : index
      %c0_19 = arith.constant 0 : index
      %26 = vector.load %arg9[%c0_18, %c0_19] : memref<8x128xf32, #tpu.memory_space<vmem>>, vector<8x128xf32>
      %c0_20 = arith.constant 0 : index
      %c0_21 = arith.constant 0 : index
      %27 = vector.load %arg7[%c0_20, %c0_21] : memref<1x128xf32, #tpu.memory_space<vmem>>, vector<1x128xf32>
      %28 = vector.broadcast %27 : vector<1x128xf32> to vector<8x128xf32>
      %29 = arith.addf %26, %28 : vector<8x128xf32>
      %c0_22 = arith.constant 0 : index
      %c0_23 = arith.constant 0 : index
      %30 = vector.load %arg8[%c0_22, %c0_23] : memref<8x128xf32, #tpu.memory_space<vmem>>, vector<8x128xf32>
      tpu.vector_store %arg8[%c0_22, %c0_23], %29 {strides = array<i32>} : memref<8x128xf32, #tpu.memory_space<vmem>>, vector<8x128xf32>,
    } else {
    }
    return
  }
  func.func @transform_0(%arg0: i32, %arg1: i32, %arg2: i32) -> (i32, i32) {
    %c0_i32 = arith.constant 0 : i32
    %c0_i32_0 = arith.constant 0 : i32
    return %arg0, %c0_i32 : i32, i32
  }
  func.func @transform_1(%arg0: i32, %arg1: i32, %arg2: i32) -> (i32, i32) {
    %c0_i32 = arith.constant 0 : i32
    %c0_i32_0 = arith.constant 0 : i32
    return %c0_i32, %arg2 : i32, i32
  }
  func.func @transform_2(%arg0: i32, %arg1: i32, %arg2: i32) -> (i32, i32) {
    %c0_i32 = arith.constant 0 : i32
    %c0_i32_0 = arith.constant 0 : i32
    return %c0_i32, %arg2 : i32, i32
  }
  func.func @transform_3(%arg0: i32, %arg1: i32, %arg2: i32) -> (i32, i32) {
    %c0_i32 = arith.constant 0 : i32
    return %arg2, %arg1 : i32, i32
  }
  func.func @transform_4(%arg0: i32, %arg1: i32, %arg2: i32) -> (i32, i32) {
    %c0_i32 = arith.constant 0 : i32
    %c0_i32_0 = arith.constant 0 : i32
    return %c0_i32, %arg1 : i32, i32
  }
  func.func @transform_5(%arg0: i32, %arg1: i32, %arg2: i32) -> (i32, i32) {
    %c0_i32 = arith.constant 0 : i32
    return %arg0, %arg1 : i32, i32
  }
}

</mosaic_0001>

<bundles_post_ra>
// kernel: tpu_custom_call.1
= control target key start
LH: loop header
LB: loop body
LE: loop exit
PB: predicated region body
PF: predicated region fallthrough
CT: control target
= control target key end

     0   :  { %10 = vsyncpa [#allocation4], 0  ;;  %s1399_s0 = inlined_call_operand.hbm [shape: bf16[16,128], index: 0, kind: input, shape index: {}]   ;;  %s1400_s1 = inlined_call_operand.hbm [shape: bf16[128,128], index: 1, kind: input, shape index: {}]   ;;  %s1401_s2 = inlined_call_operand.vmem [shape: f32[1,128], index: 2, kind: input, shape index: {}]   ;;  %s1402_s3 = inlined_call_operand.hbm [shape: bf16[128,128], index: 3, kind: input, shape index: {}]   ;;  %s1403_s4 = inlined_call_operand.vmem [shape: f32[1,128], index: 4, kind: input, shape index: {}]   ;;  %s1404_s5 = inlined_call_operand.hbm [shape: f32[16,128], index: 5, kind: output, shape index: {}]  }
   0x1   :  { %12 = vsyncpa [#allocation4 + $0x1], 0 }
   0x2   :  { %13 = vsyncpa [#allocation7], 0 }
   0x3   :  { %14 = vsyncpa [#allocation5], 0 }
   0x4   :  { %16 = vsyncpa [#allocation5 + $0x1], 0  ;;  %s1139_s18 = smov 0   ;;  %s1141_s19 = smov 0  }
   0x5   :  { %s1143_s20 = smov 0   ;;  %s1145_s21 = smov 0  }
   0x6   :  { %s1147_s22 = smov 0   ;;  %s1149_s23 = smov 0  }
   0x7 LB: > { %s727_s24 = sadd.s32 4294967295, %s1099_s23   ;;  %s728_s25 = sadd.s32 4294967294, %s1099_s23   ;;  %s1099_s23 = sphi %s1149_s23, %s22_s23   ;;  %s1095_s22 = sphi %s1147_s22, %s1426_s22   ;;  %s1091_s21 = sphi %s1145_s21, %s1425_s21   ;;  %s1087_s20 = sphi %s1143_s20, %s1424_s20   ;;  %s1083_s19 = sphi %s1141_s19, %s1423_s19   ;;  %s1079_s18 = sphi %s1139_s18, %s1422_s18  }
   0x8   : > { %p61_p0 = scmp.ne.s32.totalorder %s1083_s19, %s1079_s18  ;;  %p1173_p1 = scmp.eq.s32.totalorder %s727_s24, 0 }
   0x9   : > { %p1177_p2 = scmp.eq.s32.totalorder %s727_s24, 1  ;;  %p199_p3 = scmp.eq.s32.totalorder %s728_s25, 1 }
   0xa   : > { %s1409_s26 = scalar_select %p1173_p1, 1, 0 }
   0xb   : > { %p1183_p4 = por %p1173_p1, %p61_p0  ;;  %p729_p5 = scmp.ge.s32.totalorder %s1099_s23, 1 }
   0xc   : > { %p1188_p6 = por %p199_p3, %p61_p0  ;;  %p206_p7 = scmp.lt.s32.totalorder %s1099_s23, 3 }
   0xd   : > { %s1411_s28 = scalar_select %p1183_p4, 1, 0 }
   0xe   : > { %s1412_s29 = scalar_select %p1188_p6, 1, 0 }
   0xf   : > { %p1193_p8 = pnand %p729_p5, %p206_p7  ;;  %s1101_s6 = smov [#allocation6]  }
  0x10   : > { %s220_s7 = sshll.u32 %s1101_s6, 4  ;;  %s1102_s9 = smov [#allocation8]   ;;  %s1197_s7 = int_to_ptr.vmem [resolvable:$true] %s220_s7 }
  0x11   : > { %p834_p9 = pneg %p1193_p8  ;;  %s243_s10 = sshll.u32 %s1102_s9, 4  ;;  %s1208_s10 = int_to_ptr.vmem [resolvable:$true] %s243_s10 }
  0x12   : > { %s927_s13 = scalar_lea.hbm %s1400_s1, 1024 }
  0x13   : > { %p1204_p11 = pnand %p834_p9, %p1173_p1  ;;  %p928_p12 = scmp.ne.s32.totalorder %s1400_s1, %s927_s13 }
  0x14   : > { %p934_p5 = scmp.lt.u32.totalorder %s927_s13, %s1400_s1 }
  0x15   : > { %p929_p13 = pneg %p1204_p11 }
  0x17   : > { %p930_p0 = pnand %p929_p13, %p928_p12 }
  0x19   : > { %p931_p3 = pneg %p930_p0 }
  0x1b   : > { %p936_p7 = pnand %p934_p5, %p931_p3 }
  0x1d   : > { %939 = shalt.err (!%p936_p7)
}
  0x1e   : > { %s940_s24 = scalar_lea.vmem %s1197_s7, 1024  ;;  %p948_p1 = scmp.lt.s32.totalorder %s1197_s7, %s1197_s7 }
  0x1f   : > { %p941_p9 = scmp.ne.s32.totalorder %s1197_s7, %s940_s24  ;;  %p949_p12 = scmp.lt.s32.totalorder %s940_s24, %s940_s24 }
  0x21   : > { %p943_p10 = pnand %p941_p9, %p929_p13  ;;  %p950_p0 = por %p949_p12, %p948_p1 }
  0x23   : > { %p944_p6 = pneg %p943_p10 }
  0x25   : > { %p951_p4 = pnand %p950_p0, %p944_p6 }
  0x27   : > { %954 = shalt.err (!%p951_p4)
}
  0x28   : > { %s1103_s25 = smov 64   ;;  %s1104_s6 = smov 4  }
  0x29   : > { %837 = dma.hbm_to_vmem [thread:$0]  (!%p1204_p11), %s1400_s1, 1024, %s1197_s7, [#allocation7], %s1103_s25, %s1103_s25, %s1104_s6  }
  0x2a   : > { %s955_s14 = scalar_lea.hbm %s1402_s3, 1024 }
  0x2b   : > { %p956_p1 = scmp.ne.s32.totalorder %s1402_s3, %s955_s14  ;;  %p962_p10 = scmp.lt.u32.totalorder %s955_s14, %s1402_s3 }
  0x2d   : > { %p958_p4 = pnand %p956_p1, %p929_p13 }
  0x2f   : > { %p959_p6 = pneg %p958_p4 }
  0x31   : > { %p964_p3 = pnand %p962_p10, %p959_p6 }
  0x33   : > { %967 = shalt.err (!%p964_p3)
}
  0x34   : > { %s968_s7 = scalar_lea.vmem %s1208_s10, 1024  ;;  %p976_p12 = scmp.lt.s32.totalorder %s1208_s10, %s1208_s10 }
  0x35   : > { %p969_p5 = scmp.ne.s32.totalorder %s1208_s10, %s968_s7  ;;  %p977_p0 = scmp.lt.s32.totalorder %s968_s7, %s968_s7 }
  0x37   : > { %p971_p7 = pnand %p969_p5, %p929_p13  ;;  %p978_p1 = por %p977_p0, %p976_p12 }
  0x39   : > { %p972_p9 = pneg %p971_p7 }
  0x3b   : > { %p979_p4 = pnand %p978_p1, %p972_p9 }
  0x3d   : > { %982 = shalt.err (!%p979_p4)
}
  0x3e   : > { %840 = dma.hbm_to_vmem [thread:$0]  (!%p1204_p11), %s1402_s3, 1024, %s1208_s10, [#allocation7], %s1103_s25, %s1103_s25, %s1104_s6  }
  0x3f   : > { %s41_s12 = sadd.s32 1, %s1095_s22  ;;  %s48_s13 = sadd.s32 1, %s1087_s20 }
  0x40   : > { %p43_p13 = scmp.ge.s32.totalorder %s41_s12, 2  ;;  %p55_p6 = scmp.ne.s32.totalorder %s1087_s20, %s1083_s19 }
  0x41   : > { %p56_p10 = scmp.eq.s32.totalorder %s1099_s23, 0  ;;  %p851_p3 = scmp.lt.s32.totalorder %s1099_s23, 2 }
  0x42   : > { %s1428_s12 = smov (%p43_p13, %s41_s12), 0  ;;  %p1272_p7 = por %p1177_p2, %p55_p6 }
  0x43   : > { %p57_p5 = por %p56_p10, %p55_p6  ;;  %s45_s14 = ssub.s32 %s1095_s22, %s1428_s12 }
  0x44   : > { %s1415_s8 = scalar_select %p1272_p7, 1, 0 }
  0x45   : > { %s263_s15 = sand.u32 1, %s1087_s20   ;;  %p46_p9 = scmp.eq.s32.totalorder %s45_s14, 0 }
  0x46   : > { %s735_s10 = sshll.u32 %s263_s15, 2  ;;  %s736_s25 = sshll.u32 %s1095_s22, 6 }
  0x47   : > { %s1281_s6 = scalar_select %p46_p9, %s1087_s20, %s48_s13  }
  0x48   : > { %s1286_s24 = scalar_lea.hbm %s1399_s0, %s736_s25  ;;  %s267_s27 = scalar_lea.vmem [#allocation3], %s735_s10 }
  0x49   : > { %s274_s7 = sshll.u32 %s267_s27, 4  ;;  %p1290_p2 = pnand %p851_p3, %p57_p5  ;;  %s1294_s7 = int_to_ptr.vmem [resolvable:$true] %s274_s7 }
  0x4a   : > { %s264_s11 = scalar_lea.sflag [#allocation4], %s263_s15  ;;  %s983_s13 = scalar_lea.hbm %s1286_s24, 64 }
  0x4b   : > { %p984_p11 = scmp.ne.s32.totalorder %s1286_s24, %s983_s13  ;;  %p985_p12 = pneg %p1290_p2 }
  0x4c   : > { %s988_s25 = scalar_lea.hbm %s1399_s0, 128  ;;  %p989_p4 = scmp.lt.u32.totalorder %s1286_s24, %s1399_s0 }
  0x4d   : > { %p986_p0 = pnand %p985_p12, %p984_p11  ;;  %p990_p13 = scmp.lt.u32.totalorder %s988_s25, %s983_s13 }
  0x4e   : > { %p992_p10 = scmp.lt.u32.totalorder %s983_s13, %s1286_s24 }
  0x4f   : > { %p987_p1 = pneg %p986_p0  ;;  %p991_p6 = por %p990_p13, %p989_p4 }
  0x51   : > { %p993_p3 = por %p992_p10, %p991_p6 }
  0x53   : > { %p994_p5 = pnand %p993_p3, %p987_p1 }
  0x55   : > { %997 = shalt.err (!%p994_p5)
}
  0x56   : > { %s998_s15 = scalar_lea.vmem %s1294_s7, 64  ;;  %s1105_s27 = smov [#allocation3]  }
  0x57   : > { %p999_p9 = scmp.ne.s32.totalorder %s1294_s7, %s998_s15  ;;  %s1003_s14 = sshll.u32 %s1105_s27, 4  ;;  %s1004_s14 = int_to_ptr.vmem [resolvable:$false] %s1003_s14 }
  0x58   : > { %s1005_s10 = scalar_lea.vmem %s1004_s14, 128  ;;  %p1006_p7 = scmp.lt.s32.totalorder %s1294_s7, %s1004_s14 }
  0x59   : > { %p1001_p11 = pnand %p999_p9, %p985_p12  ;;  %p1007_p4 = scmp.lt.s32.totalorder %s1005_s10, %s998_s15 }
  0x5b   : > { %p1002_p0 = pneg %p1001_p11  ;;  %p1008_p13 = por %p1007_p4, %p1006_p7 }
  0x5d   : > { %p1009_p6 = pnand %p1008_p13, %p1002_p0 }
  0x5f   : > { %1012 = shalt.err (!%p1009_p6)
}
  0x60   : > { %844 = dma.hbm_to_vmem [thread:$0]  (!%p1290_p2), %s1286_s24, 64, %s1294_s7, %s264_s11  }
  0x61   : > { %283 = sbr.rel (%p1193_p8) target bundleno = 603 (0x25b), region = 40  ;;  %s1324_s13 = sand.u32 (!%p1193_p8), 1, %s1083_s19  }
  0x62   : > { %s738_s25 = sshll.u32 (!%p1193_p8), %s1324_s13, 2  ;;  %s286_s16 = scalar_lea.sflag (!%p1193_p8), [#allocation4], %s1324_s13 }
  0x63   : > { %s1328_s17 = scalar_lea.vmem (!%p1193_p8), [#allocation3], %s738_s25  ;;  %p1417_p7 = scmp.ne.s32.totalorder (!%p1193_p8), %s1411_s28, 0 }
  0x68   : > { %1066 = dma.done.wait (%p1417_p7), %s286_s16, 64  }
  0x69   : > { %1068 = vsyncadd (%p1417_p7), %s286_s16, 4294967232  ;;  %p1418_p2 = scmp.ne.s32.totalorder %s1409_s26, 0 }
  0x6b   : > { %1070 = dma.done.wait (%p1418_p2), [#allocation7], 2048  }
  0x6c   : > { %1072 = vsyncadd (%p1418_p2), [#allocation7], 4294965248  ;;  %v1106_v0 = vmov 0.0   ;;  %vm1107_vm0 = vmmov 0   ;;  %v909_v1 = vld [vmem:[#allocation6] sm:$0xff]   ;;  %v910_v2 = vld [vmem:[#allocation6 + $0x8] sm:$0xff]  }
  0x6d   : > { %782 = vmatprep.subr.bf16.mxu0 %v1106_v0  ;;  %798 = vmatprep.mubr.msk.bf16.mxu0 %vm1107_vm0, %v1106_v0  ;;  %v911_v3 = vld [vmem:[#allocation6 + $0x10] sm:$0xff]   ;;  %v917_v4 = vld [vmem:[#allocation8] sm:$0xff]   ;;  %v912_v5 = vld [vmem:[#allocation6 + $0x18] sm:$0xff]   ;;  %s741_s30 = sshll.u32 %s1324_s13, 3  ;;  %s761_s9 = sshll.u32 %s1091_s21, 7 }
  0x6e   : > { %802 = vmatprep.subr.bf16.mxu1 %v1106_v0  ;;  %818 = vmatprep.mubr.msk.bf16.mxu1 %vm1107_vm0, %v1106_v0  ;;  %v918_v6 = vld [vmem:[#allocation8 + $0x8] sm:$0xff]   ;;  %v913_v7 = vld [vmem:[#allocation6 + $0x20] sm:$0xff]   ;;  %v919_v8 = vld [vmem:[#allocation8 + $0x10] sm:$0xff]   ;;  %s329_s11 = scalar_lea.vmem [#allocation9], %s741_s30  ;;  %s1350_s10 = scalar_lea.hbm %s1404_s5, %s761_s9 }
  0x6f   : > { %783 = vmatpush3.bf16.msra.mxu0 %v909_v1  ;;  %803 = vmatpush3.bf16.msra.mxu1 %v917_v4  ;;  %v914_v9 = vld [vmem:[#allocation6 + $0x28] sm:$0xff]   ;;  %v915_v10 = vld [vmem:[#allocation6 + $0x30] sm:$0xff]   ;;  %v916_v11 = vld [vmem:[#allocation6 + $0x38] sm:$0xff]   ;;  %s596_s15 = sshll.u32 %s329_s11, 4  ;;  %s582_s25 = scalar_lea.sflag [#allocation5], %s1324_s13  ;;  %s1352_s15 = int_to_ptr.vmem [resolvable:$true] %s596_s15 }
  0x70   : > { %784 = vmatprep.subr.bf16.mxu0 %v1106_v0  ;;  %804 = vmatprep.subr.bf16.mxu1 %v1106_v0  ;;  %v343_v12 = vld [vmem:[%s1328_s17] sm:$0xf]  ;;  %v921_v14 = vld [vmem:[#allocation8 + $0x20] sm:$0xff]   ;;  %v922_v15 = vld [vmem:[#allocation8 + $0x28] sm:$0xff]   ;;  %s1013_s21 = scalar_lea.vmem %s1352_s15, 128  ;;  %p1419_p12 = scmp.ne.s32.totalorder %s1415_s8, 0 }
  0x71   : > { %v920_v13 = vld [vmem:[#allocation8 + $0x18] sm:$0xff]   ;;  %v923_v16 = vld [vmem:[#allocation8 + $0x30] sm:$0xff]   ;;  %p1014_p8 = scmp.ne.s32.totalorder %s1352_s15, %s1013_s21  ;;  %s1108_s16 = smov [#allocation9]  }
  0x72   : > { %v924_v17 = vld [vmem:[#allocation8 + $0x38] sm:$0xff]   ;;  %s1017_s17 = sshll.u32 %s1108_s16, 4  ;;  %s1018_s17 = int_to_ptr.vmem [resolvable:$false] %s1017_s17 }
  0x73   : > { %785 = vmatpush3.bf16.msra.mxu0 %v910_v2  ;;  %805 = vmatpush3.bf16.msra.mxu1 %v918_v6  ;;  %v742_v18 = vld [vmem:[%s1401_s2] ss:$0 sm:$0xff]  ;;  %p1015_p1 = pnand %p1014_p8, %p1419_p12  ;;  %s1019_s26 = scalar_lea.vmem %s1018_s17, 256 }
  0x74   : > { %786 = vmatprep.subr.bf16.mxu0 %v1106_v0  ;;  %806 = vmatprep.subr.bf16.mxu1 %v1106_v0  ;;  %v759_v30 = vld [vmem:[%s1403_s4] ss:$0 sm:$0xff]  ;;  %p1020_p3 = scmp.lt.s32.totalorder %s1352_s15, %s1018_s17  ;;  %p1021_p5 = scmp.lt.s32.totalorder %s1019_s26, %s1013_s21 }
  0x75   : > { %p1016_p10 = pneg %p1015_p1 }
  0x76   : > { %p1022_p9 = por %p1021_p5, %p1020_p3 }
  0x77   : > { %787 = vmatpush3.bf16.msra.mxu0 %v911_v3  ;;  %807 = vmatpush3.bf16.msra.mxu1 %v919_v8 }
  0x78   : > { %788 = vmatprep.subr.bf16.mxu0 %v1106_v0  ;;  %808 = vmatprep.subr.bf16.mxu1 %v1106_v0  ;;  %p1023_p11 = pnand %p1022_p9, %p1016_p10 }
  0x7b   : > { %789 = vmatpush3.bf16.msra.mxu0 %v912_v5  ;;  %809 = vmatpush3.bf16.msra.mxu1 %v920_v13 }
  0x7c   : > { %790 = vmatprep.subr.bf16.mxu0 %v1106_v0  ;;  %810 = vmatprep.subr.bf16.mxu1 %v1106_v0 }
  0x7f   : > { %791 = vmatpush3.bf16.msra.mxu0 %v913_v7  ;;  %811 = vmatpush3.bf16.msra.mxu1 %v921_v14 }
  0x80   : > { %792 = vmatprep.subr.bf16.mxu0 %v1106_v0  ;;  %812 = vmatprep.subr.bf16.mxu1 %v1106_v0 }
  0x83   : > { %793 = vmatpush3.bf16.msra.mxu0 %v914_v9  ;;  %813 = vmatpush3.bf16.msra.mxu1 %v922_v15 }
  0x84   : > { %794 = vmatprep.subr.bf16.mxu0 %v1106_v0  ;;  %814 = vmatprep.subr.bf16.mxu1 %v1106_v0 }
  0x87   : > { %795 = vmatpush3.bf16.msra.mxu0 %v915_v10  ;;  %815 = vmatpush3.bf16.msra.mxu1 %v923_v16 }
  0x88   : > { %796 = vmatprep.subr.bf16.mxu0 %v1106_v0  ;;  %816 = vmatprep.subr.bf16.mxu1 %v1106_v0 }
  0x8b   : > { %797 = vmatpush3.bf16.msra.mxu0 %v916_v11  ;;  %817 = vmatpush3.bf16.msra.mxu1 %v924_v17 }
  0x8e   : > { %799 = vmatmul.mubr.bf16.vlgmr.msra.gmra.mrb[0].mxu0 %v343_v12 }
 0x161   : > { %v449_v19 = vpop.f32.mrb[0].mxu0 }
 0x162   : > { %v450_v20 = vadd.f32 %v742_v18, %v449_v19  ;;  %v800_v21 = vpop.f32.mrb[1].mxu0 }
 0x163   : > { %v452_v22 = vpop.f32.mrb[2].mxu0 }
 0x164   : > { %v456_v23 = vmul.f32 0.70710677, %v450_v20  ;;  %v801_v24 = vpop.f32.mrb[3].mxu0  ;;  %v455_v26 = vmul.f32 0.5, %v450_v20 }
 0x166   : > { %925 = verf.f32 %v456_v23 }
 0x170   : > { %v926_v25 = vpop.eup %925 }
 0x171   : > { %v458_v27 = vadd.f32 1.0, %v926_v25 }
 0x173   : > { %v459_v28 = vmul.f32 %v458_v27, %v455_v26 }
 0x175   : > { %v460_v29 = vpack.c.bf16 %v459_v28, %v459_v28 }
 0x177   : > { %819 = vmatmul.mubr.bf16.vlgmr.msra.gmra.mrb[0].mxu1 %v460_v29 }
 0x24a   : > { %v560_v31 = vpop.f32.mrb[0].mxu1 }
 0x24b   : > { %v579_v32 = vadd.f32 %v759_v30, %v560_v31  ;;  %v820_v33 = vpop.f32.mrb[1].mxu1 }
 0x24c   : > { %v563_v34 = vpop.f32.mrb[2].mxu1 }
 0x24d   : > { %580 = vst [vmem:[%s329_s11] sm:$0xff] %v579_v32  ;;  %v821_v35 = vpop.f32.mrb[3].mxu1 }
 0x24e   : > { %1026 = shalt.err (!%p1023_p11)
}
 0x24f   : > { %s1027_s13 = scalar_lea.hbm %s1350_s10, 128  ;;  %s1031_s24 = scalar_lea.hbm %s1404_s5, 256 }
 0x250   : > { %p1028_p0 = scmp.ne.s32.totalorder %s1350_s10, %s1027_s13  ;;  %p1032_p6 = scmp.lt.u32.totalorder %s1350_s10, %s1404_s5 }
 0x251   : > { %p1033_p7 = scmp.lt.u32.totalorder %s1031_s24, %s1027_s13  ;;  %p1035_p8 = scmp.lt.u32.totalorder %s1027_s13, %s1350_s10 }
 0x252   : > { %p1029_p4 = pnand %p1028_p0, %p1419_p12 }
 0x253   : > { %p1034_p2 = por %p1033_p7, %p1032_p6 }
 0x254   : > { %p1030_p13 = pneg %p1029_p4 }
 0x255   : > { %p1036_p1 = por %p1035_p8, %p1034_p2 }
 0x257   : > { %p1037_p10 = pnand %p1036_p1, %p1030_p13 }
 0x259   : > { %1040 = shalt.err (!%p1037_p10)
}
 0x25a   : > { %832 = dma.vmem_to_hbm [thread:$0]  (%p1419_p12), %s1352_s15, 128, %s1350_s10, %s582_s25  }
 0x25b PF: > { %s608_s11 = sand.u32 1, %s1079_s18   ;;  %p1420_p3 = scmp.ne.s32.totalorder %s1412_s29, 0 }
 0x25c   : > { %p1421_p5 = scmp.ge.s32.totalorder %s1099_s23, 2  ;;  %s609_s27 = scalar_lea.sflag [#allocation5], %s608_s11 }
 0x25e   : > { %p846_p9 = pnand %p1421_p5, %p1420_p3 }
 0x260   : > { %1074 = dma.done.wait (!%p846_p9), %s609_s27, 128  }
 0x261   : > { %1076 = vsyncadd (!%p846_p9), %s609_s27, 4294967168  ;;  %s22_s23 = sadd.s32 1, %s1099_s23   ;;  %s1422_s18 = smov %s1083_s19 }
 0x262   : > { %p19_p11 = scmp.ge.s32.totalorder %s22_s23, 4   ;;  %s1423_s19 = smov %s1087_s20 }
 0x263   : > { %s1424_s20 = smov %s1281_s6  ;;  %s1425_s21 = smov %s1095_s22 }
 0x264   : > { %s1426_s22 = smov %s1428_s12  ;;  %21 = sbr.rel (!%p19_p11) target bundleno = 7 (0x7), region = 109 }
 0x26b   :  { %614 = vsyncpa [#allocation4], 1 }
 0x26c   :  { %616 = vsyncpa [#allocation4 + $0x1], 1 }
 0x26d   :  { %617 = vsyncpa [#allocation7], 1 }
 0x26e   :  { %618 = vsyncpa [#allocation5], 1 }
 0x26f   :  { %620 = vsyncpa [#allocation5 + $0x1], 1 }

</bundles_post_ra>
